<compile_context>
chip_gen: v6e
topology: v6e:2x2x1
jax: 0.10.0
libtpu: 0.0.40
codegen_flags: <defaults>
</compile_context>

<pallas_src>
import jax
import jax.numpy as jnp
from jax import lax
from jax.experimental import pallas as pl
from jax.experimental.pallas import tpu as pltpu

EPS = 1e-12  # torch.nn.functional.normalize default eps


def _l2_normed_linear_kernel(x_ref, w_ref, b_ref, gr_ref, br_ref, o_ref):
    # x_ref : (tb, P*D_in)   packed batch tile (streamed)
    # w_ref : (P*D_in, P*H)  block-diagonal weight (resident)
    # b_ref : (1, P*H)       tiled bias            (resident)
    # gr_ref: (P*H, P)       per-group ones reduce matrix (resident)
    # br_ref: (P, P*H)       per-group 0/1 broadcast matrix (resident)
    x = x_ref[...]

    # Linear layer on the MXU (f32 accumulate), bias folded into the same tile.
    y = jnp.dot(x, w_ref[...], preferred_element_type=jnp.float32) + b_ref[...]

    # Per-original-row squared sum via a tiny ones matmul (no cross-lane
    # VPU/XLU reduction, 16x fewer MXU flops than a (Hp,Hp) group matrix).
    sq = jnp.dot(y * y, gr_ref[...], preferred_element_type=jnp.float32)   # (tb, P)

    # out = y / max(sqrt(s), eps) == y * rsqrt(max(s, eps^2))  (accurate EUP rsqrt)
    inv = lax.rsqrt(jnp.maximum(sq, EPS * EPS))                            # (tb, P)

    # Broadcast each packed row's inverse norm back over its H-wide lane group.
    inv_b = jnp.dot(inv, br_ref[...], preferred_element_type=jnp.float32)  # (tb, P*H)

    o_ref[...] = (y * inv_b).astype(o_ref.dtype)


def prepare_l2_normed_params(w, b):
    """Build the lane-packed parameters once (hoisted out of the per-call path).

    w: (D_in, H), b: (H,).  Packs P = 128 // H original rows per kernel row so
    the kernel output is a full 128 lanes wide.
    """
    D_in, H = w.shape
    P = 128 // H if (H < 128 and 128 % H == 0) else 1
    eye_p = jnp.eye(P, dtype=jnp.float32)
    w_big = jnp.kron(eye_p, w.astype(jnp.float32))                    # (P*D_in, P*H)
    b_big = jnp.tile(b.reshape(1, H).astype(jnp.float32), (1, P))     # (1, P*H)
    g_red = jnp.kron(eye_p, jnp.ones((H, 1), dtype=jnp.float32))      # (P*H, P)
    g_brd = jnp.kron(eye_p, jnp.ones((1, H), dtype=jnp.float32))      # (P, P*H)
    return dict(P=P, D_in=D_in, H=H,
                w_big=w_big, b_big=b_big, g_red=g_red, g_brd=g_brd)


def _vmem_bytes_estimate(tb, Dp, Hp, P, out_itemsize):
    stream = 2 * tb * Dp * 4 + 2 * tb * Hp * out_itemsize          # double-buffered x / out
    resident = 2 * (Dp * Hp + Hp + Hp * P + P * Hp) * 4             # weights / bias / ones
    interm = 4 * tb * Hp * 4                                        # y, y*y, inv_b, pre-store
    return stream + resident + interm


def _choose_tile_rows(Bp, tile_rows, min_split_tile=256):
    """Pick the batch-tile size (in packed rows)."""
    tb = min(tile_rows, Bp)
    # v7x has 2 TensorCores: make sure the "parallel" grid axis has >= 2 steps
    # when the batch is big enough that splitting keeps tiles overhead-free.
    if Bp >= 2 * min_split_tile and pl.cdiv(Bp, tb) < 2:
        tb = ((Bp + 1) // 2 + 7) // 8 * 8
    return tb


def l2_normed_net_packed(x, params, *, tile_rows=4096, buffer_count=2,
                         out_dtype=jnp.float32):
    """x: (B, D_in) -> (B, H) L2-normalized along dim=1, using prepacked params."""
    B, D_in = x.shape
    P, H = params["P"], params["H"]
    assert D_in == params["D_in"]
    Dp, Hp = P * D_in, P * H

    # Pad the batch to a multiple of P so the lane-dense packed path is always
    # taken (no masked 32-lane stores); padded rows are sliced off at the end.
    B_pad = -(-B // P) * P
    if B_pad != B:
        x = jnp.pad(x, ((0, B_pad - B), (0, 0)))
    Bp = B_pad // P
    x_p = x.astype(jnp.float32).reshape(Bp, Dp)   # row-major reinterpret (no shuffle)

    # Tile selection + VMEM budgeting (v5e default scoped 16 MiB; v7x 64 MiB phys).
    out_itemsize = jnp.dtype(out_dtype).itemsize
    tb = _choose_tile_rows(Bp, tile_rows)
    budget = 36 * 1024 * 1024
    while tb > 256 and _vmem_bytes_estimate(tb, Dp, Hp, P, out_itemsize) > budget:
        tb = max(256, ((tb // 2) + 7) // 8 * 8)
    vmem_limit = int(min(48 * 1024 * 1024,
                         max(32 * 1024 * 1024,
                             1.5 * _vmem_bytes_estimate(tb, Dp, Hp, P, out_itemsize))))

    grid = (pl.cdiv(Bp, tb),)

    # Pipeline-depth sweep knob (only >2 changes codegen; default stays safe).
    stream_kwargs = {}
    if buffer_count != 2:
        stream_kwargs["pipeline_mode"] = pl.Buffered(buffer_count)

    out_p = pl.pallas_call(
        _l2_normed_linear_kernel,
        out_shape=jax.ShapeDtypeStruct((Bp, Hp), out_dtype),
        grid=grid,
        in_specs=[
            pl.BlockSpec((tb, Dp), lambda i: (i, 0), **stream_kwargs),  # streamed x
            pl.BlockSpec((Dp, Hp), lambda i: (0, 0)),                   # resident weight
            pl.BlockSpec((1, Hp), lambda i: (0, 0)),                    # resident bias
            pl.BlockSpec((Hp, P), lambda i: (0, 0)),                    # resident reduce ones
            pl.BlockSpec((P, Hp), lambda i: (0, 0)),                    # resident broadcast ones
        ],
        out_specs=pl.BlockSpec((tb, Hp), lambda i: (i, 0), **stream_kwargs),
        compiler_params=pltpu.CompilerParams(
            dimension_semantics=("parallel",),      # megacore sharding on v7x
            vmem_limit_bytes=vmem_limit,
        ),
    )(x_p, params["w_big"], params["b_big"], params["g_red"], params["g_brd"])

    out = out_p.reshape(B_pad, H)
    if B_pad != B:
        out = out[:B]
    return out


def l2_normed_net(x, w, b, **kwargs):
    """Convenience wrapper; prefer prepare_l2_normed_params once + packed call."""
    return l2_normed_net_packed(x, prepare_l2_normed_params(w, b), **kwargs)


def reference(x, w, b):
    y = x @ w + b.reshape(1, -1)
    n = jnp.sqrt(jnp.sum(y * y, axis=1, keepdims=True))
    return y / jnp.maximum(n, EPS)


if __name__ == "__main__":
    key = jax.random.PRNGKey(0)
    kx, kw, kb, kx2 = jax.random.split(key, 4)

    B, D_in, H = 8, 16, 32
    x = jax.random.normal(kx, (B, D_in), dtype=jnp.float32)
    # Deterministic "net" parameters (synthetic stand-in for nn.Linear(16, 32)).
    w = jax.random.normal(kw, (D_in, H), dtype=jnp.float32) * 0.1
    b = jax.random.normal(kb, (H,), dtype=jnp.float32) * 0.1

    # Pack parameters once (hoisted out of the per-call path).
    params = prepare_l2_normed_params(w, b)

    out = jax.block_until_ready(l2_normed_net_packed(x, params))
    ref = reference(x, w, b)
    assert out.shape == (B, H)
    assert jnp.allclose(out, ref, atol=1e-5, rtol=1e-5)
    assert jnp.allclose(jnp.linalg.norm(out, axis=1), 1.0, atol=1e-5)

    # Batch not divisible by the packing factor: exercises the padding path
    # (replaces the old P=1 masked-store fallback).
    B2 = 6
    x2 = jax.random.normal(kx2, (B2, D_in), dtype=jnp.float32)
    out2 = jax.block_until_ready(l2_normed_net_packed(x2, params))
    ref2 = reference(x2, w, b)
    assert out2.shape == (B2, H)
    assert jnp.allclose(out2, ref2, atol=1e-5, rtol=1e-5)

    print("KERNEL_OK")
</pallas_src>

<mosaic_0001>
module attributes {stable_mosaic.version = 11 : i64} {
  func.func @_l2_normed_linear_kernel(%arg0: i32, %arg1: memref<2x64xf32, #tpu.memory_space<vmem>>, %arg2: memref<64x128xf32, #tpu.memory_space<vmem>>, %arg3: memref<1x128xf32, #tpu.memory_space<vmem>>, %arg4: memref<128x4xf32, #tpu.memory_space<vmem>>, %arg5: memref<4x128xf32, #tpu.memory_space<vmem>>, %arg6: memref<2x128xf32, #tpu.memory_space<vmem>>) attributes {dimension_semantics = [#tpu.dimension_semantics<parallel>], iteration_bounds = array<i64: 1>, scalar_prefetch = 0 : i64, scratch_operands = 0 : i64, tpu.core_type = #tpu.core_type<tc>, window_params = [{transform_indices = @transform_0, window_bounds = array<i64: 2, 64>}, {pipeline_mode = #tpu.pipeline_mode<synchronous>, transform_indices = @transform_1, window_bounds = array<i64: 64, 128>}, {pipeline_mode = #tpu.pipeline_mode<synchronous>, transform_indices = @transform_2, window_bounds = array<i64: 1, 128>}, {pipeline_mode = #tpu.pipeline_mode<synchronous>, transform_indices = @transform_3, window_bounds = array<i64: 128, 4>}, {pipeline_mode = #tpu.pipeline_mode<synchronous>, transform_indices = @transform_4, window_bounds = array<i64: 4, 128>}, {transform_indices = @transform_5, window_bounds = array<i64: 2, 128>}]} {
    %c0 = arith.constant 0 : index
    %c0_0 = arith.constant 0 : index
    %0 = vector.load %arg1[%c0, %c0_0] : memref<2x64xf32, #tpu.memory_space<vmem>>, vector<2x64xf32>
    %c0_1 = arith.constant 0 : index
    %c0_2 = arith.constant 0 : index
    %1 = vector.load %arg2[%c0_1, %c0_2] : memref<64x128xf32, #tpu.memory_space<vmem>>, vector<64x128xf32>
    %cst = arith.constant dense<0.000000e+00> : vector<2x128xf32>
    %2 = tpu.matmul %0, %1, %cst {dimension_numbers = #tpu.dot_dimension_numbers<[1], [0], [0], [1], [0, 0, 1, 1], [], []>} : vector<2x64xf32>, vector<64x128xf32>, vector<2x128xf32> -> vector<2x128xf32>
    %c0_3 = arith.constant 0 : index
    %c0_4 = arith.constant 0 : index
    %3 = vector.load %arg3[%c0_3, %c0_4] : memref<1x128xf32, #tpu.memory_space<vmem>>, vector<1x128xf32>
    %4 = vector.broadcast %3 : vector<1x128xf32> to vector<2x128xf32>
    %5 = arith.addf %2, %4 : vector<2x128xf32>
    %6 = arith.mulf %5, %5 : vector<2x128xf32>
    %c0_5 = arith.constant 0 : index
    %c0_6 = arith.constant 0 : index
    %7 = vector.load %arg4[%c0_5, %c0_6] : memref<128x4xf32, #tpu.memory_space<vmem>>, vector<128x4xf32>
    %cst_7 = arith.constant dense<0.000000e+00> : vector<2x4xf32>
    %8 = tpu.matmul %6, %7, %cst_7 {dimension_numbers = #tpu.dot_dimension_numbers<[1], [0], [0], [1], [0, 0, 1, 1], [], []>} : vector<2x128xf32>, vector<128x4xf32>, vector<2x4xf32> -> vector<2x4xf32>
    %cst_8 = arith.constant 1.000000e-24 : f32
    %9 = vector.broadcast %cst_8 : f32 to vector<2x4xf32>
    %10 = arith.maximumf %8, %9 : vector<2x4xf32>
    %11 = math.rsqrt %10 : vector<2x4xf32>
    %c0_9 = arith.constant 0 : index
    %c0_10 = arith.constant 0 : index
    %12 = vector.load %arg5[%c0_9, %c0_10] : memref<4x128xf32, #tpu.memory_space<vmem>>, vector<4x128xf32>
    %cst_11 = arith.constant dense<0.000000e+00> : vector<2x128xf32>
    %13 = tpu.matmul %11, %12, %cst_11 {dimension_numbers = #tpu.dot_dimension_numbers<[1], [0], [0], [1], [0, 0, 1, 1], [], []>} : vector<2x4xf32>, vector<4x128xf32>, vector<2x128xf32> -> vector<2x128xf32>
    %14 = arith.mulf %5, %13 : vector<2x128xf32>
    %c0_12 = arith.constant 0 : index
    %c0_13 = arith.constant 0 : index
    %15 = vector.load %arg6[%c0_12, %c0_13] : memref<2x128xf32, #tpu.memory_space<vmem>>, vector<2x128xf32>
    tpu.vector_store %arg6[%c0_12, %c0_13], %14 {strides = array<i32>} : memref<2x128xf32, #tpu.memory_space<vmem>>, vector<2x128xf32>,
    return
  }
  func.func @transform_0(%arg0: i32) -> (i32, i32) {
    %c0_i32 = arith.constant 0 : i32
    %c0_i32_0 = arith.constant 0 : i32
    return %arg0, %c0_i32 : i32, i32
  }
  func.func @transform_1(%arg0: i32) -> (i32, i32) {
    %c0_i32 = arith.constant 0 : i32
    %c0_i32_0 = arith.constant 0 : i32
    %c0_i32_1 = arith.constant 0 : i32
    return %c0_i32, %c0_i32_0 : i32, i32
  }
  func.func @transform_2(%arg0: i32) -> (i32, i32) {
    %c0_i32 = arith.constant 0 : i32
    %c0_i32_0 = arith.constant 0 : i32
    %c0_i32_1 = arith.constant 0 : i32
    return %c0_i32, %c0_i32_0 : i32, i32
  }
  func.func @transform_3(%arg0: i32) -> (i32, i32) {
    %c0_i32 = arith.constant 0 : i32
    %c0_i32_0 = arith.constant 0 : i32
    %c0_i32_1 = arith.constant 0 : i32
    return %c0_i32, %c0_i32_0 : i32, i32
  }
  func.func @transform_4(%arg0: i32) -> (i32, i32) {
    %c0_i32 = arith.constant 0 : i32
    %c0_i32_0 = arith.constant 0 : i32
    %c0_i32_1 = arith.constant 0 : i32
    return %c0_i32, %c0_i32_0 : i32, i32
  }
  func.func @transform_5(%arg0: i32) -> (i32, i32) {
    %c0_i32 = arith.constant 0 : i32
    %c0_i32_0 = arith.constant 0 : i32
    return %arg0, %c0_i32 : i32, i32
  }
}

</mosaic_0001>

<bundles_post_ra>
// kernel: tpu_custom_call.1
= control target key start
LH: loop header
LB: loop body
LE: loop exit
PB: predicated region body
PF: predicated region fallthrough
CT: control target
= control target key end

     0   :  { %v413_v1 = vmov 0.0   ;;  %vm414_vm0 = vmmov 0   ;;  %s561_s0 = inlined_call_operand.vmem [shape: f32[2,64], index: 0, kind: input, shape index: {}]   ;;  %s562_s1 = inlined_call_operand.vmem [shape: f32[64,128], index: 1, kind: input, shape index: {}]   ;;  %s563_s2 = inlined_call_operand.vmem [shape: f32[1,128], index: 2, kind: input, shape index: {}]   ;;  %s564_s3 = inlined_call_operand.vmem [shape: f32[128,4], index: 3, kind: input, shape index: {}]   ;;  %s565_s4 = inlined_call_operand.vmem [shape: f32[4,128], index: 4, kind: input, shape index: {}]   ;;  %s566_s5 = inlined_call_operand.hbm [shape: f32[2,128], index: 5, kind: output, shape index: {}]  }
   0x1   :  { %v29_v0 = vld [vmem:[%s562_s1 + $0x38] sm:$0xff]  ;;  %327 = vmatprep.subr.mxu0 %v413_v1  ;;  %v28_v2 = vld [vmem:[%s562_s1 + $0x30] sm:$0xff]  ;;  %343 = vmatprep.mubr.msk.f32.mxu0 %vm414_vm0, %v413_v1  ;;  %v27_v3 = vld [vmem:[%s562_s1 + $0x28] sm:$0xff] }
   0x2   :  { %328 = vmatpush3.msra.mxu0 %v29_v0  ;;  %346 = vmatprep.subr.mxu1 %v413_v1  ;;  %v127_v4 = vld [vmem:[%s564_s3 + $0x78] sm:$0xff]  ;;  %v126_v5 = vld [vmem:[%s564_s3 + $0x70] sm:$0xff]  ;;  %v26_v6 = vld [vmem:[%s562_s1 + $0x20] sm:$0xff] }
   0x3   :  { %329 = vmatprep.subr.mxu0 %v413_v1  ;;  %378 = vmatprep.mubr.msk.f32.mxu1 %vm414_vm0, %v413_v1  ;;  %v125_v7 = vld [vmem:[%s564_s3 + $0x68] sm:$0xff]  ;;  %v25_v8 = vld [vmem:[%s562_s1 + $0x18] sm:$0xff]  ;;  %v124_v9 = vld [vmem:[%s564_s3 + $0x60] sm:$0xff] }
   0x4   :  { %330 = vmatpush3.msra.mxu0 %v28_v2  ;;  %347 = vmatpush3.msra.mxu1 %v127_v4 }
   0x5   :  { %331 = vmatprep.subr.mxu0 %v413_v1  ;;  %348 = vmatprep.subr.mxu1 %v413_v1 }
   0x6   :  { %332 = vmatpush3.msra.mxu0 %v27_v3  ;;  %349 = vmatpush3.msra.mxu1 %v126_v5 }
   0x7   :  { %333 = vmatprep.subr.mxu0 %v413_v1  ;;  %350 = vmatprep.subr.mxu1 %v413_v1 }
   0x8   :  { %10 = vsyncpa [#allocation3], 0  ;;  %334 = vmatpush3.msra.mxu0 %v26_v6  ;;  %351 = vmatpush3.msra.mxu1 %v125_v7  ;;  %v24_v10 = vld [vmem:[%s562_s1 + $0x10] sm:$0xff]  ;;  %v123_v11 = vld [vmem:[%s564_s3 + $0x58] sm:$0xff]  ;;  %vm37_vm1 = vcmask 523264   ;;  %vm205_vm2 = vcmask 1043456  }
   0x9   :  { %335 = vmatprep.subr.mxu0 %v413_v1  ;;  %352 = vmatprep.subr.mxu1 %v413_v1  ;;  %v23_v12 = vld [vmem:[%s562_s1 + $0x8] sm:$0xff]  ;;  %v122_v13 = vld [vmem:[%s564_s3 + $0x50] sm:$0xff]  ;;  %v22_v14 = vld [vmem:[%s562_s1] sm:$0xff]  ;;  %vm201_vm3 = vcmask 31744  }
   0xa   :  { %336 = vmatpush3.msra.mxu0 %v25_v8  ;;  %353 = vmatpush3.msra.mxu1 %v124_v9  ;;  %v121_v15 = vld [vmem:[%s564_s3 + $0x48] sm:$0xff]  ;;  %v21_v16 = vld [vmem:[%s561_s0] sm:$0x3]  ;;  %v119_v18 = vld [vmem:[%s564_s3 + $0x38] sm:$0xff] }
   0xb   :  { %337 = vmatprep.subr.mxu0 %v413_v1  ;;  %354 = vmatprep.subr.mxu1 %v413_v1  ;;  %v120_v17 = vld [vmem:[%s564_s3 + $0x40] sm:$0xff]  ;;  %v118_v19 = vld [vmem:[%s564_s3 + $0x30] sm:$0xff]  ;;  %v117_v20 = vld [vmem:[%s564_s3 + $0x28] sm:$0xff] }
   0xc   :  { %338 = vmatpush3.msra.mxu0 %v24_v10  ;;  %355 = vmatpush3.msra.mxu1 %v123_v11  ;;  %v116_v21 = vld [vmem:[%s564_s3 + $0x20] sm:$0xff]  ;;  %v115_v22 = vld [vmem:[%s564_s3 + $0x18] sm:$0xff]  ;;  %v114_v23 = vld [vmem:[%s564_s3 + $0x10] sm:$0xff] }
   0xd   :  { %339 = vmatprep.subr.mxu0 %v413_v1  ;;  %356 = vmatprep.subr.mxu1 %v413_v1  ;;  %v113_v24 = vld [vmem:[%s564_s3 + $0x8] sm:$0xff]  ;;  %v112_v25 = vld [vmem:[%s564_s3] sm:$0xff]  ;;  %s415_s3 = smov [#allocation2]  }
   0xe   :  { %340 = vmatpush3.msra.mxu0 %v23_v12  ;;  %357 = vmatpush3.msra.mxu1 %v122_v13  ;;  %v295_v26 = vld [vmem:[%s563_s2] ss:$0 sm:$0xff]  ;;  %s287_s2 = sshll.u32 %s415_s3, 4  ;;  %s288_s2 = int_to_ptr.vmem [resolvable:$true] %s287_s2 }
   0xf   :  { %341 = vmatprep.subr.mxu0 %v413_v1  ;;  %358 = vmatprep.subr.mxu1 %v413_v1  ;;  %v200_v31 = vld [vmem:[%s565_s4] sm:$0xf]  ;;  %s391_s20 = scalar_lea.vmem %s288_s2, 32  ;;  %p396_p1 = scmp.lt.s32.totalorder %s288_s2, %s288_s2 }
  0x10   :  { %342 = vmatpush3.msra.mxu0 %v22_v14  ;;  %359 = vmatpush3.msra.mxu1 %v121_v15  ;;  %p392_p0 = scmp.ne.s32.totalorder %s288_s2, %s391_s20  ;;  %p397_p2 = scmp.lt.s32.totalorder %s391_s20, %s391_s20 }
  0x11   :  { %344 = vmatmul.mubr.msk.f32.vlgmr.msra.gmra.mxu0 %vm37_vm1, %v21_v16  ;;  %360 = vmatprep.subr.mxu1 %v413_v1 }
  0x12   :  { %361 = vmatpush3.msra.mxu1 %v120_v17  ;;  %381 = vmatprep.subr.mxu0 %v413_v1  ;;  %p398_p3 = por %p397_p2, %p396_p1 }
  0x13   :  { %362 = vmatprep.subr.mxu1 %v413_v1  ;;  %383 = vmatprep.mubr.msk.f32.mxu0 %vm414_vm0, %v413_v1 }
  0x14   :  { %363 = vmatpush3.msra.mxu1 %v119_v18  ;;  %382 = vmatpush3.msk.msra.mxu0 %vm205_vm2, %v200_v31  ;;  %p399_p4 = pnand %p398_p3, %p392_p0 }
  0x15   :  { %364 = vmatprep.subr.mxu1 %v413_v1 }
  0x16   :  { %365 = vmatpush3.msra.mxu1 %v118_v19 }
  0x17   :  { %366 = vmatprep.subr.mxu1 %v413_v1 }
  0x18   :  { %367 = vmatpush3.msra.mxu1 %v117_v20 }
  0x19   :  { %368 = vmatprep.subr.mxu1 %v413_v1 }
  0x1a   :  { %369 = vmatpush3.msra.mxu1 %v116_v21 }
  0x1b   :  { %370 = vmatprep.subr.mxu1 %v413_v1 }
  0x1c   :  { %371 = vmatpush3.msra.mxu1 %v115_v22 }
  0x1d   :  { %372 = vmatprep.subr.mxu1 %v413_v1 }
  0x1e   :  { %373 = vmatpush3.msra.mxu1 %v114_v23 }
  0x1f   :  { %374 = vmatprep.subr.mxu1 %v413_v1 }
  0x20   :  { %375 = vmatpush3.msra.mxu1 %v113_v24 }
  0x21   :  { %376 = vmatprep.subr.mxu1 %v413_v1 }
  0x22   :  { %377 = vmatpush3.msra.mxu1 %v112_v25 }
  0xd1   :  { %v107_v27 = vpop.f32.mrf.mxu0 }
  0xd2   :  { %v108_v28 = vadd.f32 %v295_v26, %v107_v27 }
  0xd3   :  { %v345_v29 = vpop.f32.mrf.mxu0 }
  0xd4   :  { %v111_v30 = vmul.f32 %v108_v28, %v108_v28 }
  0xd6   :  { %379 = vmatmul.mubr.f32.vlgmr.msra.gmra.mxu1 %v111_v30 }
 0x196   :  { %v194_v32 = vpop.f32.mrf.mxu1 }
 0x197   :  { %v198_v33 = vmax.f32 %v194_v32, 1e-24 }
 0x198   :  { %v380_v34 = vpop.f32.mrf.mxu1 }
 0x199   :  { %389 = vrsqrt.f32 %v198_v33 }
 0x1a6   :  { %v390_v35 = vpop.eup %389 }
 0x1a7   :  { %384 = vmatmul.mubr.msk.f32.vlgmr.msra.gmra.mxu0 %vm201_vm3, %v390_v35 }
 0x267   :  { %v275_v36 = vpop.f32.mrf.mxu0 }
 0x268   :  { %v279_v37 = vmul.f32 %v275_v36, %v108_v28 }
 0x269   :  { %v385_v38 = vpop.f32.mrf.mxu0 }
 0x26a   :  { %280 = vst [vmem:[#allocation2] sm:$0x3] %v279_v37 }
 0x26b   :  { %402 = shalt.err (!%p399_p4)
}
 0x26c   :  { %290 = dma.vmem_to_hbm [thread:$0]  %s288_s2, 32, %s566_s5, [#allocation3]  }
 0x26d   :  { %411 = dma.done.wait [#allocation3], 32  }
 0x26e   :  { %412 = vsyncadd [#allocation3], 4294967264 }
 0x26f   :  { %294 = vsyncpa [#allocation3], 1 }

</bundles_post_ra>
